<compile_context>
chip_gen: v5e
topology: v5e:2x2
jax: 0.10.0
libtpu: 0.0.40
codegen_flags: <defaults>
</compile_context>

<pallas_src>
import jax
import jax.numpy as jnp
import numpy as np
from jax.experimental import pallas as pl
from jax.experimental.pallas import tpu as pltpu

_LANE = 128
_SUBLANE = 8
_TILE_BYTES = 2 << 20          # per field stream, per pipeline buffer (f32 terms)
_VMEM_LIMIT = 32 * 1024 * 1024 # safe on v5e/v6e (128 MiB phys) and v7x (64 MiB/TC)


def _phase_mask_kernel(fr_ref, fi_ref, cs_ref, or_ref, oi_ref):
    # fr/fi/or/oi refs: (TILE_ROWS, TILE_LANES); cs ref: (2, TILE_LANES)
    # row 0 = cos(phase), row 1 = sin(phase); broadcast over the row tile.
    c = cs_ref[0:1, :]
    s = cs_ref[1:2, :]
    fr = fr_ref[...].astype(jnp.float32)
    fi = fi_ref[...].astype(jnp.float32)
    or_ref[...] = (fr * c - fi * s).astype(or_ref.dtype)
    oi_ref[...] = (fr * s + fi * c).astype(oi_ref.dtype)


def _choose_tiles(n_rows, n_lanes, tile_bytes=_TILE_BYTES):
    """Pick (tile_rows, tile_lanes) with one field tile ~tile_bytes of f32.

    Pipeline footprint = 4 field streams x 2 buffers x tile_bytes plus the tiny
    (2, tile_lanes) cos/sin block -> ~17 MiB, under the 32 MiB scoped limit on
    all generations.  Also guarantees >= 2 grid steps whenever the workload can
    be split, so v7x's second TensorCore is never stranded.
    """
    elem = 4  # budget in f32 terms (conservative for bf16 fields)

    # Lane tile: the full row if a minimum-height (8-row) tile fits the budget,
    # otherwise the largest multiple of 128 that does (keeps stores unmasked).
    if _SUBLANE * n_lanes * elem <= tile_bytes:
        tile_lanes = n_lanes
    else:
        tile_lanes = max(_LANE, (tile_bytes // (_SUBLANE * elem)) // _LANE * _LANE)

    # Row tile: fill the remaining budget; multiple of 8, or the full dim.
    rows = tile_bytes // (tile_lanes * elem)
    rows = max(_SUBLANE, (rows // _SUBLANE) * _SUBLANE)
    tile_rows = n_rows if rows >= n_rows else rows

    # Megacore: make sure there are >= 2 grid steps when the work is splittable.
    if pl.cdiv(n_rows, tile_rows) * pl.cdiv(n_lanes, tile_lanes) < 2:
        if n_rows >= 2 * _SUBLANE:
            tile_rows = max(_SUBLANE, ((n_rows // 2) // _SUBLANE) * _SUBLANE)
        elif n_lanes >= 2 * _LANE:
            tile_lanes = max(_LANE, ((n_lanes // 2) // _LANE) * _LANE)
        # else: tiny workload; a single step is fine.
    return tile_rows, tile_lanes


def phase_mask_random_forward(field_r, field_i, phase):
    """field_r, field_i: (B, C, H, W) float (f32 or bf16); phase: (H, W) float32.

    Returns (out_r, out_i), each (B, C, H, W) in the field dtype, equal to the
    real/imag parts of `field * exp(1j * phase)` broadcast over (B, C).
    """
    B, C, H, W = field_r.shape
    assert phase.shape == (H, W)
    N = B * C
    L = H * W
    dtype = field_r.dtype

    # Lane-dense flattening (contiguous reshape, no data movement).
    fr = field_r.reshape(N, L)
    fi = field_i.reshape(N, L)

    # Hoisted transcendentals: cos/sin of the shared phase computed once on the
    # (H, W) plane, packed into a single (2, L) array -> one BlockSpec, one DMA
    # stream, half the phase VMEM of separate cos/sin inputs.
    phase_f32 = phase.astype(jnp.float32).reshape(1, L)
    cs = jnp.concatenate([jnp.cos(phase_f32), jnp.sin(phase_f32)], axis=0)  # (2, L)

    # Pad the lane dim to a multiple of 128 so every store is an unmasked vst.
    L_pad = ((L + _LANE - 1) // _LANE) * _LANE
    if L_pad != L:
        pad = ((0, 0), (0, L_pad - L))
        fr = jnp.pad(fr, pad)
        fi = jnp.pad(fi, pad)
        cs = jnp.pad(cs, pad)

    tile_rows, tile_lanes = _choose_tiles(N, L_pad)
    n_row_tiles = pl.cdiv(N, tile_rows)
    n_lane_tiles = pl.cdiv(L_pad, tile_lanes)

    # Lane axis OUTER, row axis INNER: the cos/sin block index is constant over
    # the inner loop, so Pallas re-fetches it only when the lane tile changes.
    grid = (n_lane_tiles, n_row_tiles)
    field_spec = pl.BlockSpec((tile_rows, tile_lanes), lambda j, i: (i, j))
    cs_spec = pl.BlockSpec((2, tile_lanes), lambda j, i: (0, j))

    cost = pl.CostEstimate(
        flops=6 * N * L,                         # 4 mul + 2 add per element
        transcendentals=0,                       # hoisted out of the kernel
        bytes_accessed=4 * N * L * dtype.itemsize + 2 * L * 4,
    )

    out_r, out_i = pl.pallas_call(
        _phase_mask_kernel,
        out_shape=(
            jax.ShapeDtypeStruct((N, L_pad), dtype),
            jax.ShapeDtypeStruct((N, L_pad), dtype),
        ),
        grid_spec=pltpu.PrefetchScalarGridSpec(
            num_scalar_prefetch=0,
            grid=grid,
            in_specs=[field_spec, field_spec, cs_spec],
            out_specs=(field_spec, field_spec),
        ),
        compiler_params=pltpu.CompilerParams(
            dimension_semantics=("parallel", "parallel"),
            vmem_limit_bytes=_VMEM_LIMIT,
        ),
        cost_estimate=cost,
    )(fr, fi, cs)

    if L_pad != L:
        out_r = out_r[:, :L]
        out_i = out_i[:, :L]
    return out_r.reshape(B, C, H, W), out_i.reshape(B, C, H, W)


def init_phase_uniform(key, grid_shape):
    """Matches PhaseMaskRandom.__init__(init_type='uniform'): 2*pi*U[0,1)."""
    return (2.0 * np.pi) * jax.random.uniform(key, grid_shape, dtype=jnp.float32)


if __name__ == "__main__":
    B, C, H, W = 2, 4, 16, 16

    key = jax.random.PRNGKey(0)
    k_phase, k_fr, k_fi = jax.random.split(key, 3)

    # Deterministic parameter init (synthetic, not a checkpoint load).
    phase = init_phase_uniform(k_phase, (H, W))

    # Complex input field represented as real/imag float32 planes.
    # TODO(synk): PyTorch module takes a complex tensor; no complex vreg dtype
    # on TPU, so the field is carried as two float planes.
    field_r = jax.random.normal(k_fr, (B, C, H, W), dtype=jnp.float32)
    field_i = jax.random.normal(k_fi, (B, C, H, W), dtype=jnp.float32)

    out_r, out_i = phase_mask_random_forward(field_r, field_i, phase)
    out_r = jax.block_until_ready(out_r)
    out_i = jax.block_until_ready(out_i)

    # Pure-JAX reference (complex64) to validate semantics.
    field_c = field_r.astype(jnp.complex64) + 1j * field_i.astype(jnp.complex64)
    ref = field_c * jnp.exp(1j * phase.astype(jnp.complex64))[None, None]
    np.testing.assert_allclose(np.asarray(out_r), np.real(np.asarray(ref)),
                               rtol=1e-5, atol=1e-5)
    np.testing.assert_allclose(np.asarray(out_i), np.imag(np.asarray(ref)),
                               rtol=1e-5, atol=1e-5)

    print("KERNEL_OK")
</pallas_src>

<mosaic_0001>
module attributes {stable_mosaic.version = 11 : i64} {
  func.func @_phase_mask_kernel(%arg0: i32, %arg1: i32, %arg2: memref<8x128xf32, #tpu.memory_space<vmem>>, %arg3: memref<8x128xf32, #tpu.memory_space<vmem>>, %arg4: memref<2x128xf32, #tpu.memory_space<vmem>>, %arg5: memref<8x128xf32, #tpu.memory_space<vmem>>, %arg6: memref<8x128xf32, #tpu.memory_space<vmem>>) attributes {dimension_semantics = [#tpu.dimension_semantics<parallel>, #tpu.dimension_semantics<parallel>], iteration_bounds = array<i64: 2, 1>, scalar_prefetch = 0 : i64, scratch_operands = 0 : i64, tpu.core_type = #tpu.core_type<tc>, window_params = [{transform_indices = @transform_0, window_bounds = array<i64: 8, 128>}, {transform_indices = @transform_1, window_bounds = array<i64: 8, 128>}, {transform_indices = @transform_2, window_bounds = array<i64: 2, 128>}, {transform_indices = @transform_3, window_bounds = array<i64: 8, 128>}, {transform_indices = @transform_4, window_bounds = array<i64: 8, 128>}]} {
    %c0 = arith.constant 0 : index
    %c0_0 = arith.constant 0 : index
    %0 = vector.load %arg4[%c0, %c0_0] : memref<2x128xf32, #tpu.memory_space<vmem>>, vector<1x128xf32>
    %c1 = arith.constant 1 : index
    %c0_1 = arith.constant 0 : index
    %1 = vector.load %arg4[%c1, %c0_1] : memref<2x128xf32, #tpu.memory_space<vmem>>, vector<1x128xf32>
    %c0_2 = arith.constant 0 : index
    %c0_3 = arith.constant 0 : index
    %2 = vector.load %arg2[%c0_2, %c0_3] : memref<8x128xf32, #tpu.memory_space<vmem>>, vector<8x128xf32>
    %c0_4 = arith.constant 0 : index
    %c0_5 = arith.constant 0 : index
    %3 = vector.load %arg3[%c0_4, %c0_5] : memref<8x128xf32, #tpu.memory_space<vmem>>, vector<8x128xf32>
    %4 = vector.broadcast %0 : vector<1x128xf32> to vector<8x128xf32>
    %5 = arith.mulf %2, %4 : vector<8x128xf32>
    %6 = vector.broadcast %1 : vector<1x128xf32> to vector<8x128xf32>
    %7 = arith.mulf %3, %6 : vector<8x128xf32>
    %8 = arith.subf %5, %7 : vector<8x128xf32>
    %c0_6 = arith.constant 0 : index
    %c0_7 = arith.constant 0 : index
    %9 = vector.load %arg5[%c0_6, %c0_7] : memref<8x128xf32, #tpu.memory_space<vmem>>, vector<8x128xf32>
    tpu.vector_store %arg5[%c0_6, %c0_7], %8 {strides = array<i32>} : memref<8x128xf32, #tpu.memory_space<vmem>>, vector<8x128xf32>,
    %10 = vector.broadcast %1 : vector<1x128xf32> to vector<8x128xf32>
    %11 = arith.mulf %2, %10 : vector<8x128xf32>
    %12 = vector.broadcast %0 : vector<1x128xf32> to vector<8x128xf32>
    %13 = arith.mulf %3, %12 : vector<8x128xf32>
    %14 = arith.addf %11, %13 : vector<8x128xf32>
    %c0_8 = arith.constant 0 : index
    %c0_9 = arith.constant 0 : index
    %15 = vector.load %arg6[%c0_8, %c0_9] : memref<8x128xf32, #tpu.memory_space<vmem>>, vector<8x128xf32>
    tpu.vector_store %arg6[%c0_8, %c0_9], %14 {strides = array<i32>} : memref<8x128xf32, #tpu.memory_space<vmem>>, vector<8x128xf32>,
    return
  }
  func.func @transform_0(%arg0: i32, %arg1: i32) -> (i32, i32) {
    %c0_i32 = arith.constant 0 : i32
    return %arg1, %arg0 : i32, i32
  }
  func.func @transform_1(%arg0: i32, %arg1: i32) -> (i32, i32) {
    %c0_i32 = arith.constant 0 : i32
    return %arg1, %arg0 : i32, i32
  }
  func.func @transform_2(%arg0: i32, %arg1: i32) -> (i32, i32) {
    %c0_i32 = arith.constant 0 : i32
    %c0_i32_0 = arith.constant 0 : i32
    return %c0_i32, %arg0 : i32, i32
  }
  func.func @transform_3(%arg0: i32, %arg1: i32) -> (i32, i32) {
    %c0_i32 = arith.constant 0 : i32
    return %arg1, %arg0 : i32, i32
  }
  func.func @transform_4(%arg0: i32, %arg1: i32) -> (i32, i32) {
    %c0_i32 = arith.constant 0 : i32
    return %arg1, %arg0 : i32, i32
  }
}

</mosaic_0001>

<bundles_post_ra>
// kernel: tpu_custom_call.1
= control target key start
LH: loop header
LB: loop body
LE: loop exit
PB: predicated region body
PF: predicated region fallthrough
CT: control target
= control target key end

     0   :  { %s1062_s0 = inlined_call_operand.hbm [shape: f32[8,256], index: 0, kind: input, shape index: {}]   ;;  %s1063_s1 = inlined_call_operand.hbm [shape: f32[8,256], index: 1, kind: input, shape index: {}]   ;;  %s1064_s2 = inlined_call_operand.hbm [shape: f32[2,256], index: 2, kind: input, shape index: {}]   ;;  %s1065_s3 = inlined_call_operand.hbm [shape: f32[8,256], index: 3, kind: output, shape index: {0}]   ;;  %s1066_s4 = inlined_call_operand.hbm [shape: f32[8,256], index: 4, kind: output, shape index: {1}]  }
   0x1   :  { %1073 = sst [smem:[#allocation21_spill]] %s1063_s1 }
   0x2   :  { %10 = vsyncpa [#allocation3], 0 }
   0x3   :  { %12 = vsyncpa [#allocation3 + $0x1], 0 }
   0x4   :  { %13 = vsyncpa [#allocation6], 0 }
   0x5   :  { %15 = vsyncpa [#allocation6 + $0x1], 0 }
   0x6   :  { %16 = vsyncpa [#allocation4], 0 }
   0x7   :  { %18 = vsyncpa [#allocation4 + $0x1], 0 }
   0x8   :  { %19 = vsyncpa [#allocation10], 0 }
   0x9   :  { %21 = vsyncpa [#allocation10 + $0x1], 0  ;;  %s876_s15 = smov 0   ;;  %s878_s16 = smov 0  }
   0xa   :  { %s880_s17 = smov 0   ;;  %s882_s18 = smov 0  }
   0xb   :  { %s884_s19 = smov 0   ;;  %s886_s20 = smov 0  }
   0xc LB: > { %1074 = sst [smem:[#allocation15_spill]] %s829_s15  ;;  %s907_s21 = sadd.s32 4294967295, %s849_s20   ;;  %s849_s20 = sphi %s886_s20, %s27_s20   ;;  %s845_s19 = sphi %s884_s19, %s1096_s19   ;;  %s841_s18 = sphi %s882_s18, %s1095_s18   ;;  %s837_s17 = sphi %s880_s17, %s1091_s17   ;;  %s833_s16 = sphi %s878_s16, %s1094_s16   ;;  %s829_s15 = sphi %s876_s15, %s1093_s15  }
   0xd   : > { %1075 = sst [smem:[#allocation16_spill]] %s837_s17  ;;  %s541_s22 = sadd.s32 4294967294, %s849_s20  }
   0xe   : > { %1076 = sst [smem:[#allocation17_spill]] %s849_s20  ;;  %s39_s23 = sadd.s32 1, %s845_s19 }
   0xf   : > { %s48_s24 = sadd.s32 1, %s837_s17  ;;  %p41_p0 = scmp.ge.s32.totalorder %s39_s23, 2 }
  0x10   : > { %p55_p1 = scmp.ne.s32.totalorder %s837_s17, %s833_s16  ;;  %p56_p2 = scmp.eq.s32.totalorder %s849_s20, 0 }
  0x11   : > { %p61_p3 = scmp.ne.s32.totalorder %s833_s16, %s829_s15  ;;  %s1098_s23 = smov (%p41_p0, %s39_s23), 0 }
  0x12   : > { %1077 = sst [smem:[#allocation18_spill]] %s1098_s23  ;;  %p919_p4 = por %p56_p2, %p55_p1 }
  0x13   : > { %p62_p5 = scmp.eq.s32.totalorder %s907_s21, 0  ;;  %s44_s26 = ssub.s32 %s845_s19, %s1098_s23 }
  0x14   : > { %p141_p6 = scmp.eq.s32.totalorder %s907_s21, 1  ;;  %p46_p7 = scmp.eq.s32.totalorder %s44_s26, 0 }
  0x15   : > { %p927_p8 = por %p62_p5, %p61_p3  ;;  %p147_p10 = scmp.eq.s32.totalorder %s541_s22, 1 }
  0x16   : > { %p931_p9 = por %p141_p6, %p55_p1  ;;  %p543_p12 = scmp.ge.s32.totalorder %s849_s20, 2 }
  0x17   : > { %s936_s29 = scalar_select %p46_p7, %s837_s17, %s48_s24  }
  0x18   : > { %p938_p11 = por %p147_p10, %p61_p3  ;;  %p589_p13 = scmp.lt.s32.totalorder %s849_s20, 2 }
  0x19   : > { %1081 = sst [smem:[#allocation19_spill]] %s936_s29  ;;  %s195_s5 = sand.u32 1, %s837_s17  }
  0x1a   : > { %s1082_s30 = scalar_select %p938_p11, 1, 0 }
  0x1b   : > { %s544_s6 = sshll.u32 %s195_s5, 3  ;;  %s545_s7 = sshll.u32 %s845_s19, 3 }
  0x1c   : > { %1083 = sst [smem:[#allocation20_spill]] %s1082_s30  ;;  %p948_p0 = pnand %p589_p13, %p919_p4 }
  0x1d   : > { %s216_s9 = sand.u32 1, %s849_s20   ;;  %s1085_s1 = sld [smem:[#allocation21_spill]] }
  0x1e   : > { %s220_s14 = scalar_lea.vmem [#allocation5], %s544_s6  ;;  %s217_s24 = scalar_lea.sflag [#allocation6], %s216_s9 }
  0x1f   : > { %s230_s22 = sshll.u32 %s220_s14, 4  ;;  %p550_p1 = scmp.ge.s32.totalorder %s849_s20, 1  ;;  %s231_s22 = int_to_ptr.vmem [resolvable:$true] %s230_s22 }
  0x20   : > { %p254_p2 = scmp.lt.s32.totalorder %s849_s20, 3  ;;  %s205_s10 = scalar_lea.hbm %s1062_s0, %s545_s7 }
  0x21   : > { %s207_s11 = sshll.u32 %s205_s10, 4  ;;  %s548_s9 = sshll.u32 %s195_s5, 1  ;;  %s208_s11 = int_to_ptr.hbm [resolvable:$true] %s207_s11 }
  0x22   : > { %p960_p3 = pnand %p550_p1, %p254_p2  ;;  %s241_s30 = scalar_lea.vmem [#allocation7], %s548_s9 }
  0x23   : > { %s226_s12 = scalar_lea.hbm %s1085_s1, %s545_s7  ;;  %s196_s1 = scalar_lea.sflag [#allocation3], %s195_s5 }
  0x24   : > { %s228_s13 = sshll.u32 %s226_s12, 4  ;;  %s199_s12 = scalar_lea.vmem [#allocation2], %s544_s6  ;;  %s229_s13 = int_to_ptr.hbm [resolvable:$true] %s228_s13 }
  0x25   : > { %578 = dma.hbm_to_vmem [thread:$0]  (!%p948_p0), %s229_s13, 128, %s231_s22, %s217_s24  }
  0x26   : > { %s209_s14 = sshll.u32 %s199_s12, 4  ;;  %s549_s13 = sshll.u32 %s845_s19, 1  ;;  %s210_s14 = int_to_ptr.vmem [resolvable:$true] %s209_s14 }
  0x27   : > { %575 = dma.hbm_to_vmem [thread:$0]  (!%p948_p0), %s208_s11, 128, %s210_s14, %s196_s1  }
  0x28   : > { %s245_s17 = scalar_lea.hbm %s1064_s2, %s549_s13  ;;  %s249_s15 = sshll.u32 %s241_s30, 4  ;;  %s250_s15 = int_to_ptr.vmem [resolvable:$true] %s249_s15 }
  0x29   : > { %s247_s20 = sshll.u32 %s245_s17, 4  ;;  %258 = sbr.rel (%p960_p3) target bundleno = 80 (0x50), region = 32  ;;  %s248_s20 = int_to_ptr.hbm [resolvable:$true] %s247_s20 }
  0x2a   : > { %581 = dma.hbm_to_vmem [thread:$0]  (!%p948_p0), %s248_s20, 32, %s250_s15, %s217_s24  }
  0x2b   : > { %s978_s23 = sand.u32 (!%p960_p3), 1, %s833_s16  }
  0x2c   : > { %s981_s1 = sshll.u32 (!%p960_p3), %s978_s23, 3  ;;  %s261_s29 = scalar_lea.sflag (!%p960_p3), [#allocation3], %s978_s23 }
  0x2d   : > { %s264_s17 = scalar_lea.vmem (!%p960_p3), [#allocation2], %s981_s1 }
  0x2e   : > { %812 = dma.done.wait (%p927_p8), %s261_s29, 128  }
  0x2f   : > { %814 = vsyncadd (%p927_p8), %s261_s29, 4294967168  ;;  %s270_s15 = sand.u32 1, %s907_s21   ;;  %s274_s30 = scalar_lea.vmem [#allocation5], %s981_s1 }
  0x30   : > { %s271_s20 = scalar_lea.sflag [#allocation6], %s270_s15 }
  0x31   : > { %816 = dma.done.wait (%p927_p8), %s271_s20, 160  }
  0x32   : > { %818 = vsyncadd (%p927_p8), %s271_s20, 4294967136  ;;  %s553_s5 = sshll.u32 %s978_s23, 1  ;;  %s558_s6 = sshll.u32 %s841_s18, 3  ;;  %v327_v0 = vld [vmem:[%s264_s17] sm:$0xff]  ;;  %v328_v1 = vld [vmem:[%s274_s30] sm:$0xff] }
  0x33   : > { %s357_s24 = scalar_lea.hbm %s1065_s3, %s558_s6  ;;  %s284_s25 = scalar_lea.vmem [#allocation7], %s553_s5 }
  0x34   : > { %s373_s10 = scalar_lea.hbm %s1066_s4, %s558_s6  ;;  %v639_v2 = vld [vmem:[%s284_s25] ss:$0 sm:$0xff]  ;;  %v640_v3 = vld [vmem:[%s284_s25 + $0x1] ss:$0 sm:$0xff]  ;;  %s317_s27 = scalar_lea.vmem [#allocation8], %s981_s1 }
  0x35   : > { %s1004_s11 = sshll.u32 %s317_s27, 4  ;;  %s324_s12 = scalar_lea.vmem [#allocation9], %s981_s1  ;;  %v330_v4 = vmul.f32 %v639_v2, %v327_v0  ;;  %v332_v5 = vmul.f32 %v640_v3, %v328_v1  ;;  %v335_v6 = vmul.f32 %v640_v3, %v327_v0  ;;  %v336_v7 = vmul.f32 %v639_v2, %v328_v1  ;;  %s360_s11 = int_to_ptr.vmem [resolvable:$true] %s1004_s11 }
  0x36   : > { %s1007_s18 = sshll.u32 %s324_s12, 4  ;;  %s361_s14 = sshll.u32 %s357_s24, 4  ;;  %s376_s18 = int_to_ptr.vmem [resolvable:$true] %s1007_s18  ;;  %s362_s14 = int_to_ptr.hbm [resolvable:$true] %s361_s14 }
  0x37   : > { %s377_s9 = sshll.u32 %s373_s10, 4  ;;  %v333_v8 = vsub.f32 %v330_v4, %v332_v5  ;;  %v337_v9 = vadd.f32 %v336_v7, %v335_v6  ;;  %s340_s13 = scalar_lea.sflag [#allocation4], %s978_s23  ;;  %s1011_s9 = int_to_ptr.hbm [resolvable:$true] %s377_s9 }
  0x38   : > { %s745_s22 = sshra.s32 %s362_s14, 4  ;;  %s751_s15 = scalar_lea.hbm %s1065_s3, 16  ;;  %s746_s22 = int_to_ptr.hbm [resolvable:$true] %s745_s22 }
  0x39   : > { %334 = vst [vmem:[%s317_s27] sm:$0xff] %v333_v8  ;;  %s747_s1 = scalar_lea.hbm %s746_s22, 8  ;;  %p752_p7 = scmp.lt.s32.totalorder %s746_s22, %s1065_s3 }
  0x3a   : > { %338 = vst [vmem:[%s324_s12] sm:$0xff] %v337_v9  ;;  %p748_p4 = scmp.ne.s32.totalorder %s746_s22, %s747_s1  ;;  %p753_p8 = scmp.lt.s32.totalorder %s751_s15, %s747_s1 }
  0x3c   : > { %p749_p5 = pnand %p748_p4, %p931_p9  ;;  %p754_p10 = por %p753_p8, %p752_p7 }
  0x3e   : > { %p750_p6 = pneg %p749_p5 }
  0x40   : > { %p755_p13 = pnand %p754_p10, %p750_p6 }
  0x42   : > { %758 = shalt.err (!%p755_p13)
}
  0x43   : > { %568 = dma.vmem_to_hbm [thread:$0]  (%p931_p9), %s360_s11, 128, %s362_s14, %s340_s13  }
  0x44   : > { %s345_s5 = scalar_lea.sflag [#allocation10], %s978_s23  ;;  %s773_s6 = sshra.s32 %s1011_s9, 4  ;;  %s774_s6 = int_to_ptr.hbm [resolvable:$true] %s773_s6 }
  0x45   : > { %s775_s7 = scalar_lea.hbm %s774_s6, 8  ;;  %s779_s25 = scalar_lea.hbm %s1066_s4, 16 }
  0x46   : > { %p776_p0 = scmp.ne.s32.totalorder %s774_s6, %s775_s7  ;;  %p780_p3 = scmp.lt.s32.totalorder %s774_s6, %s1066_s4 }
  0x47   : > { %p781_p4 = scmp.lt.s32.totalorder %s779_s25, %s775_s7 }
  0x48   : > { %p777_p1 = pnand %p776_p0, %p931_p9 }
  0x49   : > { %p782_p5 = por %p781_p4, %p780_p3 }
  0x4a   : > { %p778_p2 = pneg %p777_p1 }
  0x4c   : > { %p783_p6 = pnand %p782_p5, %p778_p2 }
  0x4e   : > { %786 = shalt.err (!%p783_p6)
}
  0x4f   : > { %569 = dma.vmem_to_hbm [thread:$0]  (%p931_p9), %s376_s18, 128, %s1011_s9, %s345_s5  }
  0x50 PF: > { %s1087_s23 = sld [smem:[#allocation15_spill]]  ;;  %p583_p7 = pnand %p543_p12, %p938_p11 }
  0x51   : > { %s1089_s27 = sld [smem:[#allocation17_spill]] }
  0x52   : > { %p584_p8 = pneg %p583_p7 }
  0x56   : > { %s389_s11 = sand.u32 1, %s1087_s23  }
  0x57   : > { %s390_s12 = scalar_lea.sflag [#allocation4], %s389_s11 }
  0x58   : > { %820 = dma.done.wait (%p584_p8), %s390_s12, 128  }
  0x59   : > { %822 = vsyncadd (%p584_p8), %s390_s12, 4294967168  ;;  %s400_s14 = scalar_lea.sflag [#allocation10], %s389_s11 }
  0x5a   : > { %824 = dma.done.wait (%p584_p8), %s400_s14, 128  }
  0x5b   : > { %826 = vsyncadd (%p584_p8), %s400_s14, 4294967168  ;;  %s27_s20 = sadd.s32 1, %s1089_s27   ;;  %s1090_s28 = sld [smem:[#allocation16_spill]] }
  0x5c   : > { %p24_p10 = scmp.ge.s32.totalorder %s27_s20, 4   ;;  %s1091_s17 = sld [smem:[#allocation19_spill]] }
  0x5d   : > { %s1092_s9 = sld [smem:[#allocation18_spill]]  ;;  %s1093_s15 = smov %s833_s16 }
  0x5e   : > { %s1095_s18 = smov %s845_s19 }
  0x5f   :  { %26 = sbr.rel (!%p24_p10) target bundleno = 12 (0xc), region = 118 }
  0x61   : > { %s1094_s16 = smov %s1090_s28 }
  0x63   : > { %s1096_s19 = smov %s1092_s9 }
  0x64   :  { %406 = vsyncpa [#allocation3], 1 }
  0x65   :  { %408 = vsyncpa [#allocation3 + $0x1], 1 }
  0x66   :  { %409 = vsyncpa [#allocation6], 1 }
  0x67   :  { %411 = vsyncpa [#allocation6 + $0x1], 1 }
  0x68   :  { %412 = vsyncpa [#allocation4], 1 }
  0x69   :  { %414 = vsyncpa [#allocation4 + $0x1], 1 }
  0x6a   :  { %415 = vsyncpa [#allocation10], 1 }
  0x6b   :  { %417 = vsyncpa [#allocation10 + $0x1], 1 }

</bundles_post_ra>
